<compile_context>
chip_gen: v7x
topology: tpu7x:2x2x1
jax: 0.10.0
libtpu: 0.0.40
codegen_flags: <defaults>
</compile_context>

<pallas_src>
import math

import jax
import jax.numpy as jnp
from jax.experimental import pallas as pl
from jax.experimental.pallas import tpu as pltpu


def _make_limlp_kernel(num_layers, num_chunks, sub_rows):
    """Fused kernel for a chain of `num_layers` LILinear layers.

    Ref order: x, src, (wt_T, bt, w_T, b) * num_layers, out.
    All activation tiles are node-major: [rows (sublane), features (lane)].
    """

    def kernel(x_ref, src_ref, *refs):
        out_ref = refs[-1]
        prm = refs[:-1]

        def chunk(r0):
            src = src_ref[pl.ds(r0, sub_rows), :]            # [sub, origin]
            act = x_ref[pl.ds(r0, sub_rows), :]              # [sub, in_f]
            for l in range(num_layers):
                wt_t, bt, w_t, b = prm[4 * l: 4 * l + 4]
                # t_src = src @ Wt^T + bt        -> [sub, in_f_l]
                t_src = jnp.dot(src, wt_t[...],
                                preferred_element_type=jnp.float32) + bt[...]
                # act = (act * t_src) @ W^T + b  -> [sub, out_f_l]
                act = jnp.dot(act * t_src, w_t[...],
                              preferred_element_type=jnp.float32) + b[...]
            out_ref[pl.ds(r0, sub_rows), :] = act.astype(out_ref.dtype)

        if num_chunks == 1:
            chunk(0)
        else:
            @pl.loop(0, num_chunks)
            def _(c):
                chunk(pl.multiple_of(c * sub_rows, sub_rows))

    return kernel


def _pad_tile_bytes(r, c, dt_bytes=4):
    """VMEM bytes of an [r, c] f32 array under native (8, 128) tiling."""
    return (-(-r // 8) * 8) * (-(-c // 128) * 128) * dt_bytes


def limlp_forward(x, h_self, layer_params, *, tn=8192, sub=128,
                  vmem_budget=40 * 1024 * 1024):
    """Fused LIMLP forward: x [N, in_f], h_self [N, origin] -> [N, out_f]."""
    n, in_f = x.shape
    origin = h_self.shape[1]
    num_layers = len(layer_params)
    out_f = layer_params[-1]["w"].shape[0]

    x = x.astype(jnp.float32)
    src = h_self.astype(jnp.float32)

    # Conservative resident-weight VMEM estimate (x2 for pipeline buffering).
    w_bytes = 0
    for p in layer_params:
        out_l, in_l = p["w"].shape
        orig = p["wt"].shape[1]
        w_bytes += 2 * (_pad_tile_bytes(orig, in_l) + _pad_tile_bytes(1, in_l)
                        + _pad_tile_bytes(in_l, out_l) + _pad_tile_bytes(1, out_l))

    def io_bytes(rows):
        # Double-buffered x/src/out blocks (lane-padded to 128 in VMEM).
        return 2 * (_pad_tile_bytes(rows, in_f) + _pad_tile_bytes(rows, origin)
                    + _pad_tile_bytes(rows, out_f))

    if n <= sub:
        tn_eff = n                       # single full-extent block, one chunk
        sub_eff = n
    else:
        sub_eff = sub
        tn_eff = max(sub, (tn // sub) * sub)
        # v7x has 2 TensorCores: make sure a modest N still yields >= 2 grid
        # steps under dimension_semantics=("parallel",).
        half = (pl.cdiv(n, 2) // sub) * sub
        tn_eff = max(sub, min(tn_eff, max(sub, half)))
        # Shrink the DMA tile to the VMEM budget (v5e scoped default is 16 MiB,
        # v7x physical VMEM is 64 MiB).
        while tn_eff > sub and io_bytes(tn_eff) + w_bytes > vmem_budget:
            tn_eff = max(sub, (tn_eff // 2 // sub) * sub)

    num_chunks = max(1, tn_eff // sub_eff)
    grid = (pl.cdiv(n, tn_eff),)

    in_specs = [
        pl.BlockSpec((tn_eff, in_f), lambda i: (i, 0)),      # x tile (node-major)
        pl.BlockSpec((tn_eff, origin), lambda i: (i, 0)),    # src tile (shared)
    ]
    weight_args = []
    flops = 0
    for p in layer_params:
        out_l, in_l = p["w"].shape
        orig = p["wt"].shape[1]
        wt_t = p["wt"].T.astype(jnp.float32)                 # [origin, in_l]
        bt = p["bt"].astype(jnp.float32).reshape(1, -1)      # [1, in_l]
        w_t = p["w"].T.astype(jnp.float32)                   # [in_l, out_l]
        b = p["b"].astype(jnp.float32).reshape(1, -1)        # [1, out_l]
        for arr in (wt_t, bt, w_t, b):
            weight_args.append(arr)
            # Constant index_map -> weights stay resident across the row grid.
            # (pl.Buffered(1) would halve weight residency for large hidden
            # sizes on v7x; negligible at these widths, so omitted for safety.)
            in_specs.append(pl.BlockSpec(arr.shape, lambda i: (0, 0)))
        flops += 2 * n * (orig * in_l + in_l * out_l) + 3 * n * in_l

    cost = pl.CostEstimate(
        flops=flops,
        transcendentals=0,
        bytes_accessed=4 * (x.size + src.size + n * out_f
                            + sum(a.size for a in weight_args)),
    )

    out = pl.pallas_call(
        _make_limlp_kernel(num_layers, num_chunks, sub_eff),
        out_shape=jax.ShapeDtypeStruct((n, out_f), jnp.float32),
        grid_spec=pltpu.PrefetchScalarGridSpec(
            num_scalar_prefetch=0,
            grid=grid,
            in_specs=in_specs,
            out_specs=pl.BlockSpec((tn_eff, out_f), lambda i: (i, 0)),
        ),
        compiler_params=pltpu.CompilerParams(
            dimension_semantics=("parallel",),
            vmem_limit_bytes=48 * 1024 * 1024,
        ),
        cost_estimate=cost,
    )(x, src, *weight_args)

    return out                                               # [N, out_f]


def _kaiming_uniform(key, shape, fan_in, a=math.sqrt(5)):
    gain = math.sqrt(2.0 / (1.0 + a * a))
    bound = gain * math.sqrt(3.0 / fan_in)
    return jax.random.uniform(key, shape, jnp.float32, -bound, bound)


def init_lilinear_params(key, in_features, out_features, origin_infeat):
    """Deterministic init matching the PyTorch parameter shapes/roles."""
    k = jax.random.split(key, 4)
    # main weight [out, in] + bias [out]
    w = _kaiming_uniform(k[0], (out_features, in_features), in_features)
    bound = 1.0 / math.sqrt(in_features)
    b = jax.random.uniform(k[1], (out_features,), jnp.float32, -bound, bound)
    # trans_src: nn.Linear(origin_infeat, in_features): weight [in, origin], bias [in]
    wt = _kaiming_uniform(k[2], (in_features, origin_infeat), origin_infeat)
    bt_bound = 1.0 / math.sqrt(origin_infeat)
    bt = jax.random.uniform(k[3], (in_features,), jnp.float32, -bt_bound, bt_bound)
    # w_src exists in __init__ but is unused in forward -> not materialized.
    return dict(w=w, b=b, wt=wt, bt=bt)


def limlp_reference(x, h_self, layer_params):
    """Pure-JAX reference of the PyTorch forward (ReLUs skipped by LISeq)."""
    hi = jax.lax.Precision.HIGHEST
    out = x
    for p in layer_params:
        t_src = jnp.dot(h_self, p["wt"].T, precision=hi) + p["bt"]
        out = jnp.dot(out * t_src, p["w"].T, precision=hi) + p["b"]
    return out


if __name__ == "__main__":
    # Small shapes consistent with the module:
    #   num_layers=2, input_channels=16, hidden_channels=32,
    #   output_channels=16, origin_infeat=8, N (nodes / batch) = 16.
    N = 16
    input_channels = 16
    hidden_channels = 32
    output_channels = 16
    origin_infeat = 8

    key = jax.random.PRNGKey(0)
    kx, kh, k1, k2 = jax.random.split(key, 4)

    x = jax.random.normal(kx, (N, input_channels), jnp.float32)
    h_self = jax.random.normal(kh, (N, origin_infeat), jnp.float32)

    params = [
        init_lilinear_params(k1, input_channels, hidden_channels, origin_infeat),
        init_lilinear_params(k2, hidden_channels, output_channels, origin_infeat),
    ]

    out = jax.block_until_ready(limlp_forward(x, h_self, params))
    ref = limlp_reference(x, h_self, params)
    assert out.shape == (N, output_channels)
    assert jnp.allclose(out, ref, atol=1e-3, rtol=1e-3), "mismatch vs reference"

    # Second check: multi-block grid, in-kernel 128-row sub-tiling, and a
    # partial (clamped) last block -- no padding copies, no wrapper transposes.
    N2 = 1000
    kx2, kh2 = jax.random.split(jax.random.PRNGKey(1), 2)
    x2 = jax.random.normal(kx2, (N2, input_channels), jnp.float32)
    h2 = jax.random.normal(kh2, (N2, origin_infeat), jnp.float32)
    out2 = jax.block_until_ready(limlp_forward(x2, h2, params))
    ref2 = limlp_reference(x2, h2, params)
    assert out2.shape == (N2, output_channels)
    assert jnp.allclose(out2, ref2, atol=1e-3, rtol=1e-3), "mismatch (tiled path)"

    print("KERNEL_OK")
</pallas_src>

<mosaic_0001>
module attributes {stable_mosaic.version = 11 : i64} {
  func.func @kernel(%arg0: i32, %arg1: memref<16x16xf32, #tpu.memory_space<vmem>>, %arg2: memref<16x8xf32, #tpu.memory_space<vmem>>, %arg3: memref<8x16xf32, #tpu.memory_space<vmem>>, %arg4: memref<1x16xf32, #tpu.memory_space<vmem>>, %arg5: memref<16x32xf32, #tpu.memory_space<vmem>>, %arg6: memref<1x32xf32, #tpu.memory_space<vmem>>, %arg7: memref<8x32xf32, #tpu.memory_space<vmem>>, %arg8: memref<1x32xf32, #tpu.memory_space<vmem>>, %arg9: memref<32x16xf32, #tpu.memory_space<vmem>>, %arg10: memref<1x16xf32, #tpu.memory_space<vmem>>, %arg11: memref<16x16xf32, #tpu.memory_space<vmem>>) attributes {dimension_semantics = [#tpu.dimension_semantics<parallel>], iteration_bounds = array<i64: 1>, scalar_prefetch = 0 : i64, scratch_operands = 0 : i64, tpu.core_type = #tpu.core_type<tc>, window_params = [{transform_indices = @transform_0, window_bounds = array<i64: 16, 16>}, {transform_indices = @transform_1, window_bounds = array<i64: 16, 8>}, {pipeline_mode = #tpu.pipeline_mode<synchronous>, transform_indices = @transform_2, window_bounds = array<i64: 8, 16>}, {pipeline_mode = #tpu.pipeline_mode<synchronous>, transform_indices = @transform_3, window_bounds = array<i64: 1, 16>}, {pipeline_mode = #tpu.pipeline_mode<synchronous>, transform_indices = @transform_4, window_bounds = array<i64: 16, 32>}, {pipeline_mode = #tpu.pipeline_mode<synchronous>, transform_indices = @transform_5, window_bounds = array<i64: 1, 32>}, {pipeline_mode = #tpu.pipeline_mode<synchronous>, transform_indices = @transform_6, window_bounds = array<i64: 8, 32>}, {pipeline_mode = #tpu.pipeline_mode<synchronous>, transform_indices = @transform_7, window_bounds = array<i64: 1, 32>}, {pipeline_mode = #tpu.pipeline_mode<synchronous>, transform_indices = @transform_8, window_bounds = array<i64: 32, 16>}, {pipeline_mode = #tpu.pipeline_mode<synchronous>, transform_indices = @transform_9, window_bounds = array<i64: 1, 16>}, {transform_indices = @transform_10, window_bounds = array<i64: 16, 16>}]} {
    %c0 = arith.constant 0 : index
    %c0_0 = arith.constant 0 : index
    %0 = vector.load %arg2[%c0, %c0_0] : memref<16x8xf32, #tpu.memory_space<vmem>>, vector<16x8xf32>
    %c0_1 = arith.constant 0 : index
    %c0_2 = arith.constant 0 : index
    %1 = vector.load %arg1[%c0_1, %c0_2] : memref<16x16xf32, #tpu.memory_space<vmem>>, vector<16x16xf32>
    %c0_3 = arith.constant 0 : index
    %c0_4 = arith.constant 0 : index
    %2 = vector.load %arg3[%c0_3, %c0_4] : memref<8x16xf32, #tpu.memory_space<vmem>>, vector<8x16xf32>
    %cst = arith.constant dense<0.000000e+00> : vector<16x16xf32>
    %3 = tpu.matmul %0, %2, %cst {dimension_numbers = #tpu.dot_dimension_numbers<[1], [0], [0], [1], [0, 0, 1, 1], [], []>} : vector<16x8xf32>, vector<8x16xf32>, vector<16x16xf32> -> vector<16x16xf32>
    %c0_5 = arith.constant 0 : index
    %c0_6 = arith.constant 0 : index
    %4 = vector.load %arg4[%c0_5, %c0_6] : memref<1x16xf32, #tpu.memory_space<vmem>>, vector<1x16xf32>
    %5 = vector.broadcast %4 : vector<1x16xf32> to vector<16x16xf32>
    %6 = arith.addf %3, %5 : vector<16x16xf32>
    %7 = arith.mulf %1, %6 : vector<16x16xf32>
    %c0_7 = arith.constant 0 : index
    %c0_8 = arith.constant 0 : index
    %8 = vector.load %arg5[%c0_7, %c0_8] : memref<16x32xf32, #tpu.memory_space<vmem>>, vector<16x32xf32>
    %cst_9 = arith.constant dense<0.000000e+00> : vector<16x32xf32>
    %9 = tpu.matmul %7, %8, %cst_9 {dimension_numbers = #tpu.dot_dimension_numbers<[1], [0], [0], [1], [0, 0, 1, 1], [], []>} : vector<16x16xf32>, vector<16x32xf32>, vector<16x32xf32> -> vector<16x32xf32>
    %c0_10 = arith.constant 0 : index
    %c0_11 = arith.constant 0 : index
    %10 = vector.load %arg6[%c0_10, %c0_11] : memref<1x32xf32, #tpu.memory_space<vmem>>, vector<1x32xf32>
    %11 = vector.broadcast %10 : vector<1x32xf32> to vector<16x32xf32>
    %12 = arith.addf %9, %11 : vector<16x32xf32>
    %c0_12 = arith.constant 0 : index
    %c0_13 = arith.constant 0 : index
    %13 = vector.load %arg7[%c0_12, %c0_13] : memref<8x32xf32, #tpu.memory_space<vmem>>, vector<8x32xf32>
    %cst_14 = arith.constant dense<0.000000e+00> : vector<16x32xf32>
    %14 = tpu.matmul %0, %13, %cst_14 {dimension_numbers = #tpu.dot_dimension_numbers<[1], [0], [0], [1], [0, 0, 1, 1], [], []>} : vector<16x8xf32>, vector<8x32xf32>, vector<16x32xf32> -> vector<16x32xf32>
    %c0_15 = arith.constant 0 : index
    %c0_16 = arith.constant 0 : index
    %15 = vector.load %arg8[%c0_15, %c0_16] : memref<1x32xf32, #tpu.memory_space<vmem>>, vector<1x32xf32>
    %16 = vector.broadcast %15 : vector<1x32xf32> to vector<16x32xf32>
    %17 = arith.addf %14, %16 : vector<16x32xf32>
    %18 = arith.mulf %12, %17 : vector<16x32xf32>
    %c0_17 = arith.constant 0 : index
    %c0_18 = arith.constant 0 : index
    %19 = vector.load %arg9[%c0_17, %c0_18] : memref<32x16xf32, #tpu.memory_space<vmem>>, vector<32x16xf32>
    %cst_19 = arith.constant dense<0.000000e+00> : vector<16x16xf32>
    %20 = tpu.matmul %18, %19, %cst_19 {dimension_numbers = #tpu.dot_dimension_numbers<[1], [0], [0], [1], [0, 0, 1, 1], [], []>} : vector<16x32xf32>, vector<32x16xf32>, vector<16x16xf32> -> vector<16x16xf32>
    %c0_20 = arith.constant 0 : index
    %c0_21 = arith.constant 0 : index
    %21 = vector.load %arg10[%c0_20, %c0_21] : memref<1x16xf32, #tpu.memory_space<vmem>>, vector<1x16xf32>
    %22 = vector.broadcast %21 : vector<1x16xf32> to vector<16x16xf32>
    %23 = arith.addf %20, %22 : vector<16x16xf32>
    %c0_22 = arith.constant 0 : index
    %c0_23 = arith.constant 0 : index
    %24 = vector.load %arg11[%c0_22, %c0_23] : memref<16x16xf32, #tpu.memory_space<vmem>>, vector<16x16xf32>
    tpu.vector_store %arg11[%c0_22, %c0_23], %23 {strides = array<i32>} : memref<16x16xf32, #tpu.memory_space<vmem>>, vector<16x16xf32>,
    return
  }
  func.func @transform_0(%arg0: i32) -> (i32, i32) {
    %c0_i32 = arith.constant 0 : i32
    %c0_i32_0 = arith.constant 0 : i32
    return %arg0, %c0_i32 : i32, i32
  }
  func.func @transform_1(%arg0: i32) -> (i32, i32) {
    %c0_i32 = arith.constant 0 : i32
    %c0_i32_0 = arith.constant 0 : i32
    return %arg0, %c0_i32 : i32, i32
  }
  func.func @transform_2(%arg0: i32) -> (i32, i32) {
    %c0_i32 = arith.constant 0 : i32
    %c0_i32_0 = arith.constant 0 : i32
    %c0_i32_1 = arith.constant 0 : i32
    return %c0_i32, %c0_i32_0 : i32, i32
  }
  func.func @transform_3(%arg0: i32) -> (i32, i32) {
    %c0_i32 = arith.constant 0 : i32
    %c0_i32_0 = arith.constant 0 : i32
    %c0_i32_1 = arith.constant 0 : i32
    return %c0_i32, %c0_i32_0 : i32, i32
  }
  func.func @transform_4(%arg0: i32) -> (i32, i32) {
    %c0_i32 = arith.constant 0 : i32
    %c0_i32_0 = arith.constant 0 : i32
    %c0_i32_1 = arith.constant 0 : i32
    return %c0_i32, %c0_i32_0 : i32, i32
  }
  func.func @transform_5(%arg0: i32) -> (i32, i32) {
    %c0_i32 = arith.constant 0 : i32
    %c0_i32_0 = arith.constant 0 : i32
    %c0_i32_1 = arith.constant 0 : i32
    return %c0_i32, %c0_i32_0 : i32, i32
  }
  func.func @transform_6(%arg0: i32) -> (i32, i32) {
    %c0_i32 = arith.constant 0 : i32
    %c0_i32_0 = arith.constant 0 : i32
    %c0_i32_1 = arith.constant 0 : i32
    return %c0_i32, %c0_i32_0 : i32, i32
  }
  func.func @transform_7(%arg0: i32) -> (i32, i32) {
    %c0_i32 = arith.constant 0 : i32
    %c0_i32_0 = arith.constant 0 : i32
    %c0_i32_1 = arith.constant 0 : i32
    return %c0_i32, %c0_i32_0 : i32, i32
  }
  func.func @transform_8(%arg0: i32) -> (i32, i32) {
    %c0_i32 = arith.constant 0 : i32
    %c0_i32_0 = arith.constant 0 : i32
    %c0_i32_1 = arith.constant 0 : i32
    return %c0_i32, %c0_i32_0 : i32, i32
  }
  func.func @transform_9(%arg0: i32) -> (i32, i32) {
    %c0_i32 = arith.constant 0 : i32
    %c0_i32_0 = arith.constant 0 : i32
    %c0_i32_1 = arith.constant 0 : i32
    return %c0_i32, %c0_i32_0 : i32, i32
  }
  func.func @transform_10(%arg0: i32) -> (i32, i32) {
    %c0_i32 = arith.constant 0 : i32
    %c0_i32_0 = arith.constant 0 : i32
    return %arg0, %c0_i32 : i32, i32
  }
}

</mosaic_0001>

<bundles_post_ra>
// kernel: tpu_custom_call.1
= control target key start
LH: loop header
LB: loop body
LE: loop exit
PB: predicated region body
PF: predicated region fallthrough
CT: control target
= control target key end

     0   :  { %vm48_vm0 = vcmask 64512   ;;  %s640_s0 = inlined_call_operand.vmem [shape: f32[16,16], index: 0, kind: input, shape index: {}]   ;;  %s641_s1 = inlined_call_operand.vmem [shape: f32[16,8], index: 1, kind: input, shape index: {}]   ;;  %s642_s2 = inlined_call_operand.vmem [shape: f32[8,16], index: 2, kind: input, shape index: {}]   ;;  %s643_s3 = inlined_call_operand.vmem [shape: f32[1,16], index: 3, kind: input, shape index: {}]   ;;  %s644_s4 = inlined_call_operand.vmem [shape: f32[16,32], index: 4, kind: input, shape index: {}]   ;;  %s645_s5 = inlined_call_operand.vmem [shape: f32[1,32], index: 5, kind: input, shape index: {}]   ;;  %s646_s6 = inlined_call_operand.vmem [shape: f32[8,32], index: 6, kind: input, shape index: {}]   ;;  %s647_s7 = inlined_call_operand.vmem [shape: f32[1,32], index: 7, kind: input, shape index: {}]   ;;  %s648_s8 = inlined_call_operand.vmem [shape: f32[32,16], index: 8, kind: input, shape index: {}]   ;;  %s649_s9 = inlined_call_operand.vmem [shape: f32[1,16], index: 9, kind: input, shape index: {}]   ;;  %s650_s10 = inlined_call_operand.hbm [shape: f32[16,16], index: 10, kind: output, shape index: {}]  }
   0x1   :  { %v40_v0 = vld [vmem:[%s642_s2] sm:$0xff]  ;;  %v37_v2 = vld [vmem:[%s641_s1 + $0x8] sm:$0xff] }
   0x2   :  { %v36_v1 = vld [vmem:[%s641_s1] sm:$0xff]  ;;  %447 = vmatprep.subr.mxu0 %v40_v0 }
   0x3   :  { %449 = vmatprep.mubr.msk.f32.mxu0 %vm48_vm0, %v36_v1 }
   0x4   :  { %15 = vsyncpa [#allocation3], 0  ;;  %448 = vmatpush3.msra.mxu0 %v40_v0  ;;  %v132_v3 = vld [vmem:[%s644_s4] sm:$0xff]  ;;  %v133_v4 = vld [vmem:[%s644_s4 + $0x8] sm:$0xff]  ;;  %vm141_vm1 = vcmask 130048   ;;  %vm319_vm2 = vcmask 261120  }
   0x5   :  { %450 = vmatmul.mubr.msk.f32.vlgmr.msra.gmra.mrb[0].mxu0 %vm48_vm0, %v37_v2  ;;  %v475_v5 = vpack.c.bf16 %v133_v4, %v132_v3  ;;  %v223_v6 = vld [vmem:[%s646_s6] sm:$0xff]  ;;  %v39_v12 = vld [vmem:[%s640_s0 + $0x8] sm:$0xff]  ;;  %v310_v19 = vld [vmem:[%s648_s8 + $0x10] sm:$0xff] }
   0x6   :  { %v419_v7 = vld [vmem:[%s643_s3] ss:$0 sm:$0xff]  ;;  %v309_v17 = vld [vmem:[%s648_s8 + $0x8] sm:$0xff]  ;;  %v311_v20 = vld [vmem:[%s648_s8 + $0x18] sm:$0xff] }
   0x7   :  { %476 = vmatprep.subr.bf16.mxu0 %v475_v5  ;;  %v38_v10 = vld [vmem:[%s640_s0] sm:$0xff]  ;;  %v483_v21 = vpack.c.bf16 %v311_v20, %v310_v19 }
   0x8   :  { %478 = vmatpush3.bf16.msra.mxu0 %v475_v5  ;;  %v308_v16 = vld [vmem:[%s648_s8] sm:$0xff] }
   0x9   :  { %459 = vmatprep.subr.mxu0 %v223_v6  ;;  %v479_v18 = vpack.c.bf16 %v309_v17, %v308_v16  ;;  %v422_v24 = vld [vmem:[%s645_s5] ss:$0 sm:$0xff]  ;;  %s514_s5 = smov [#allocation2]  }
   0xa   :  { %v425_v25 = vld [vmem:[%s647_s7] ss:$0 sm:$0xff]  ;;  %s408_s18 = sshll.u32 %s514_s5, 4  ;;  %s409_s18 = int_to_ptr.vmem [resolvable:$true] %s408_s18 }
   0xb   :  { %480 = vmatprep.subr.bf16.mxu1 %v479_v18  ;;  %v428_v34 = vld [vmem:[%s649_s9] ss:$0 sm:$0xff]  ;;  %s490_s7 = scalar_lea.vmem %s409_s18, 256  ;;  %p495_p1 = scmp.lt.s32.totalorder %s409_s18, %s409_s18 }
   0xc   :  { %482 = vmatpush3.bf16.msra.mxu1 %v479_v18  ;;  %p491_p0 = scmp.ne.s32.totalorder %s409_s18, %s490_s7  ;;  %p496_p2 = scmp.lt.s32.totalorder %s490_s7, %s490_s7 }
   0xd   :  { %484 = vmatprep.subr.bf16.mxu1 %v483_v21 }
   0xe   :  { %p497_p3 = por %p496_p2, %p495_p1 }
  0x10   :  { %486 = vmatpush3.bf16.msra.mxu1 %v483_v21  ;;  %p498_p4 = pnand %p497_p3, %p491_p0 }
  0xd8   :  { %v451_v8 = vpop.f32.mrb[0].mxu0 }
  0xd9   :  { %v127_v9 = vadd.f32 %v451_v8, %v419_v7  ;;  %v121_v11 = vpop.f32.mrb[1].mxu0 }
  0xda   :  { %v122_v13 = vadd.f32 %v419_v7, %v121_v11 }
  0xdb   :  { %v131_v15 = vmul.f32 %v127_v9, %v39_v12 }
  0xdc   :  { %v130_v14 = vmul.f32 %v122_v13, %v38_v10 }
  0xde   :  { %456 = vmatprep.mubr.msk.f32.mxu0 %vm141_vm1, %v130_v14 }
  0xdf   :  { %457 = vmatmul.mubr.msk.f32.vlgmr.msra.gmra.mrb[2].mxu0 %vm141_vm1, %v131_v15 }
  0xe0   :  { %460 = vmatpush3.msra.mxu0 %v223_v6  ;;  %461 = vmatprep.mubr.msk.f32.mxu0 %vm48_vm0, %v36_v1 }
  0xe3   :  { %462 = vmatmul.mubr.msk.f32.vlgmr.msra.gmra.mrb[4].mxu0 %vm48_vm0, %v37_v2 }
 0x1b2   :  { %v458_v22 = vpop.f32.mrb[2].mxu0 }
 0x1b3   :  { %v214_v23 = vpop.f32.mrb[3].mxu0  ;;  %v220_v27 = vadd.f32 %v458_v22, %v422_v24 }
 0x1b4   :  { %v215_v30 = vadd.f32 %v422_v24, %v214_v23 }
 0x1b6   :  { %v463_v26 = vpop.f32.mrb[4].mxu0 }
 0x1b7   :  { %v303_v28 = vadd.f32 %v463_v26, %v425_v25  ;;  %v297_v29 = vpop.f32.mrb[5].mxu0 }
 0x1b8   :  { %v298_v31 = vadd.f32 %v425_v25, %v297_v29 }
 0x1b9   :  { %v307_v32 = vmul.f32 %v303_v28, %v220_v27 }
 0x1ba   :  { %v306_v33 = vmul.f32 %v298_v31, %v215_v30 }
 0x1bc   :  { %472 = vmatprep.mubr.msk.f32.mxu1 %vm319_vm2, %v306_v33 }
 0x1bd   :  { %473 = vmatmul.mubr.msk.f32.vlgmr.msra.gmra.mrb[0].mxu1 %vm319_vm2, %v307_v32 }
 0x290   :  { %v474_v35 = vpop.f32.mrb[0].mxu1 }
 0x291   :  { %v398_v36 = vadd.f32 %v474_v35, %v428_v34  ;;  %v392_v37 = vpop.f32.mrb[1].mxu1 }
 0x292   :  { %v393_v38 = vadd.f32 %v428_v34, %v392_v37 }
 0x293   :  { %402 = vst.msk [vmem:[#allocation2 + $0x8] sm:$0xff] %vm141_vm1, %v398_v36 }
 0x294   :  { %401 = vst.msk [vmem:[#allocation2] sm:$0xff] %vm141_vm1, %v393_v38 }
 0x295   :  { %501 = shalt.err (!%p498_p4)
}
 0x296   :  { %s502_s20 = scalar_lea.hbm %s650_s10, 256 }
 0x297   :  { %p503_p5 = scmp.ne.s32.totalorder %s650_s10, %s502_s20  ;;  %p506_p6 = scmp.lt.u32.totalorder %s502_s20, %s650_s10 }
 0x299   :  { %p508_p7 = pnand %p506_p6, %p503_p5 }
 0x29b   :  { %511 = shalt.err (!%p508_p7)
}
 0x29c   :  { %s515_s23 = smov 128   ;;  %s516_s24 = smov 8  }
 0x29d   :  { %414 = dma.vmem_to_hbm [thread:$0]  %s409_s18, 256, %s650_s10, [#allocation3], %s515_s23, %s515_s23, %s516_s24  }
 0x29e   :  { %512 = dma.done.wait [#allocation3], 256  }
 0x29f   :  { %513 = vsyncadd [#allocation3], 4294967040 }
 0x2a0   :  { %418 = vsyncpa [#allocation3], 1 }

</bundles_post_ra>
